<compile_context>
chip_gen: v5e
topology: v5e:2x2
jax: 0.10.0
libtpu: 0.0.40
codegen_flags: <defaults>
</compile_context>

<pallas_src>
import functools

import jax
import jax.numpy as jnp
from jax.experimental import pallas as pl
from jax.experimental.pallas import tpu as pltpu


def _round_up(x, m):
    return (x + m - 1) // m * m


# ---------------- Pass 1: conv (no bias) -> store bf16 + per-channel stats ----
def _conv_stats_kernel(patches_ref, w_ref, conv_ref, sum_ref, ssq_ref):
    @pl.when(pl.program_id(1) == 0)
    def _():
        sum_ref[...] = jnp.zeros_like(sum_ref)
        ssq_ref[...] = jnp.zeros_like(ssq_ref)

    # (TILE_M, Kp) @ (Kp, Cp) on the MXU, bf16 operands, fp32 accumulation.
    conv = jnp.dot(patches_ref[...], w_ref[...],
                   preferred_element_type=jnp.float32)
    # Store the activation once (bf16) so pass 2 never touches the MXU again.
    conv_ref[...] = conv.astype(conv_ref.dtype)
    # Zero-padded M rows and zero-padded K/Cout columns contribute exactly 0
    # (the conv bias is folded into the pass-2 shift), so the global BatchNorm
    # statistics stay unbiased without any row masking.
    sum_ref[...] += jnp.sum(conv, axis=0, keepdims=True).reshape(sum_ref.shape)
    ssq_ref[...] += jnp.sum(conv * conv, axis=0,
                            keepdims=True).reshape(ssq_ref.shape)


# ---------------- Pass 2: elementwise scale*x + shift -> LeakyReLU ------------
def _bn_lrelu_kernel(conv_ref, scale_ref, shift_ref, out_ref, *, neg_slope):
    y = conv_ref[...].astype(jnp.float32) * scale_ref[...] + shift_ref[...]
    out_ref[...] = jnp.where(y >= 0, y, neg_slope * y).astype(out_ref.dtype)


# ---------------- Host-side glue ----------------------------------------------
def _im2col_nchw(x, stride):
    """x: (N, C, H, W) -> patches (N*Ho*Wo, C*3*3), PyTorch-weight-compatible order."""
    n, c, h, w = x.shape
    xp = jnp.pad(x, ((0, 0), (0, 0), (1, 1), (1, 1)))
    ho = (h + 2 - 3) // stride + 1
    wo = (w + 2 - 3) // stride + 1
    cols = []
    for kh in range(3):
        for kw in range(3):
            cols.append(xp[:, :,
                           kh: kh + stride * (ho - 1) + 1: stride,
                           kw: kw + stride * (wo - 1) + 1: stride])
    patches = jnp.stack(cols, axis=0)                    # (9, N, C, Ho, Wo)
    patches = jnp.transpose(patches, (1, 3, 4, 2, 0))    # (N, Ho, Wo, C, 9)
    return patches.reshape(n * ho * wo, c * 9), ho, wo


def _choose_tile_and_vmem(m, k_pad, cout_pad):
    """Per-generation M tile + scoped-VMEM limit derived from physical VMEM."""
    try:
        vmem_cap = int(getattr(pltpu.get_tpu_info(), "vmem_capacity_bytes",
                               64 * 1024 * 1024))
    except Exception:
        vmem_cap = 64 * 1024 * 1024                      # v7x worst case
    vmem_limit = min(max(vmem_cap // 2, 16 * 1024 * 1024), 64 * 1024 * 1024)

    # Resident blocks: weight matrix (conservatively counted double-buffered)
    # plus the small per-channel scale/shift/sum/ssq vectors.
    resident = 2 * (k_pad * cout_pad * 2) + 16 * cout_pad * 4
    budget = max(vmem_limit - resident, 1 * 1024 * 1024) // 2   # pipeline headroom

    # Pass-1 per-M-row VMEM bytes (pass 2 is strictly smaller):
    #   double-buffered bf16 patches block + double-buffered bf16 conv-out block
    #   + f32 conv and conv*conv temporaries.
    per_row = 2 * (k_pad * 2) + 2 * (cout_pad * 2) + 2 * (cout_pad * 4)

    cap = 8192 if vmem_cap >= 96 * 1024 * 1024 else 4096        # v6e/v5e vs v7x
    tile_m = min(cap, max(budget // per_row, 16))
    # bf16 packs 16 rows per sublane vreg; prefer 512/256-aligned M tiles to
    # keep the 256-wide MXU fed and amortize per-grid-step overhead.
    for align in (512, 256, 16):
        if tile_m >= align:
            tile_m = (tile_m // align) * align
            break
    tile_m = max(16, tile_m)
    tile_m = min(tile_m, _round_up(m, 16))
    return tile_m, vmem_limit


def leaky_block(x, conv_w, conv_b, bn_gamma, bn_beta, *, stride,
                eps=1e-5, neg_slope=0.01, channels_last=False,
                out_dtype=jnp.bfloat16):
    """x: (N, Cin, H, W); conv_w: (Cout, Cin, 3, 3); returns (N, Cout, Ho, Wo)."""
    n = x.shape[0]
    cout = conv_w.shape[0]

    # bf16 operands for the MXU / halved HBM traffic of the im2col matrix.
    patches, ho, wo = _im2col_nchw(x.astype(jnp.bfloat16), stride)
    m, k = patches.shape

    k_pad = _round_up(k, 128)
    cout_pad = _round_up(cout, 128)
    tile_m, vmem_limit = _choose_tile_and_vmem(m, k_pad, cout_pad)

    total_tiles = pl.cdiv(m, tile_m)
    num_cores = 2 if total_tiles >= 2 else 1        # v7x: split pass 1 over 2 TCs
    tiles_per_core = pl.cdiv(total_tiles, num_cores)
    num_tiles_total = num_cores * tiles_per_core
    m_pad = num_tiles_total * tile_m

    patches = jnp.pad(patches, ((0, m_pad - m), (0, k_pad - k)))
    # (Cout, Cin, 3, 3) -> (Cout, Cin*9) -> (K, Cout), then pad to (Kp, Cp).
    w_mat = conv_w.reshape(cout, -1).T.astype(jnp.bfloat16)
    w_mat = jnp.pad(w_mat, ((0, k_pad - k), (0, cout_pad - cout)))

    # -------- Pass 1: conv activation (bf16) + global per-channel statistics --
    conv_flat, csum, cssq = pl.pallas_call(
        _conv_stats_kernel,
        out_shape=(jax.ShapeDtypeStruct((m_pad, cout_pad), jnp.bfloat16),
                   jax.ShapeDtypeStruct((num_cores, 1, cout_pad), jnp.float32),
                   jax.ShapeDtypeStruct((num_cores, 1, cout_pad), jnp.float32)),
        grid=(num_cores, tiles_per_core),
        in_specs=[
            pl.BlockSpec((tile_m, k_pad),
                         lambda c, i: (c * tiles_per_core + i, 0)),
            pl.BlockSpec((k_pad, cout_pad), lambda c, i: (0, 0)),
        ],
        out_specs=(
            pl.BlockSpec((tile_m, cout_pad),
                         lambda c, i: (c * tiles_per_core + i, 0)),
            pl.BlockSpec((1, 1, cout_pad), lambda c, i: (c, 0, 0)),
            pl.BlockSpec((1, 1, cout_pad), lambda c, i: (c, 0, 0)),
        ),
        compiler_params=pltpu.CompilerParams(
            dimension_semantics=("parallel", "arbitrary"),
            vmem_limit_bytes=vmem_limit),
    )(patches, w_mat)

    # -------- Glue: fold conv bias + BN(training stats) into scale/shift ------
    pad_c = cout_pad - cout
    bias = jnp.pad(conv_b.astype(jnp.float32), (0, pad_c)).reshape(1, cout_pad)
    gamma = jnp.pad(bn_gamma.astype(jnp.float32), (0, pad_c)).reshape(1, cout_pad)
    beta = jnp.pad(bn_beta.astype(jnp.float32), (0, pad_c)).reshape(1, cout_pad)

    inv_m = 1.0 / float(m)                       # real rows only (padding is 0)
    csum_t = jnp.sum(csum, axis=0)               # reduce per-core partials
    cssq_t = jnp.sum(cssq, axis=0)
    mean_nb = csum_t * inv_m                     # mean of conv WITHOUT bias
    var = jnp.maximum(cssq_t * inv_m - mean_nb * mean_nb, 0.0)  # biased variance
    mean = mean_nb + bias                        # mean of conv WITH bias
    scale = gamma * jax.lax.rsqrt(var + eps)
    shift = (bias - mean) * scale + beta         # y = conv_nb*scale + shift

    # -------- Pass 2: elementwise affine + LeakyReLU on the stored activation -
    out_flat = pl.pallas_call(
        functools.partial(_bn_lrelu_kernel, neg_slope=neg_slope),
        out_shape=jax.ShapeDtypeStruct((m_pad, cout_pad), out_dtype),
        grid=(num_tiles_total,),
        in_specs=[pl.BlockSpec((tile_m, cout_pad), lambda i: (i, 0)),
                  pl.BlockSpec((1, cout_pad), lambda i: (0, 0)),
                  pl.BlockSpec((1, cout_pad), lambda i: (0, 0))],
        out_specs=pl.BlockSpec((tile_m, cout_pad), lambda i: (i, 0)),
        compiler_params=pltpu.CompilerParams(
            dimension_semantics=("parallel",),
            vmem_limit_bytes=vmem_limit),
    )(conv_flat, scale, shift)

    out = out_flat[:m, :cout].reshape(n, ho, wo, cout)        # NHWC
    if channels_last:
        return out
    # TODO(synk): keep channels_last=True when the consumer accepts NHWC to
    # skip this extra HBM pass (NHWC->NCHW transpose).
    return out.transpose(0, 3, 1, 2)


def _reference(x, conv_w, conv_b, gamma, beta, *, stride, eps=1e-5, neg_slope=0.01):
    out = jax.lax.conv_general_dilated(
        x, conv_w, window_strides=(stride, stride), padding=((1, 1), (1, 1)),
        dimension_numbers=("NCHW", "OIHW", "NCHW"))
    out = out + conv_b.reshape(1, -1, 1, 1)
    mean = out.mean(axis=(0, 2, 3), keepdims=True)
    var = ((out - mean) ** 2).mean(axis=(0, 2, 3), keepdims=True)
    y = (out - mean) * jax.lax.rsqrt(var + eps)
    y = y * gamma.reshape(1, -1, 1, 1) + beta.reshape(1, -1, 1, 1)
    return jnp.where(y >= 0, y, neg_slope * y)


if __name__ == "__main__":
    # features = [Cin, Cout, stride]
    cin, cout, stride = 4, 8, 2
    n, h, w = 2, 16, 16

    key = jax.random.PRNGKey(0)
    kx, kw_, kb = jax.random.split(key, 3)

    x = jax.random.normal(kx, (n, cin, h, w), dtype=jnp.float32)
    conv_w = jax.random.normal(kw_, (cout, cin, 3, 3), dtype=jnp.float32) * 0.1
    conv_b = jax.random.normal(kb, (cout,), dtype=jnp.float32) * 0.1
    bn_gamma = jnp.ones((cout,), dtype=jnp.float32)
    bn_beta = jnp.zeros((cout,), dtype=jnp.float32)

    out = leaky_block(x, conv_w, conv_b, bn_gamma, bn_beta, stride=stride)
    out = jax.block_until_ready(out)
    assert out.shape == (n, cout, h // stride, w // stride), out.shape

    ref = _reference(x, conv_w, conv_b, bn_gamma, bn_beta, stride=stride)
    # Tolerance covers bf16 MXU operands, the bf16 conv intermediate and the
    # bf16 output writeback (all intentional HBM/FLOP savings).
    max_err = float(jnp.max(jnp.abs(out.astype(jnp.float32) - ref)))
    assert max_err < 6e-2, f"max abs error vs reference: {max_err}"

    print("KERNEL_OK")
</pallas_src>

<mosaic_0001>
module attributes {stable_mosaic.version = 11 : i64} {
  func.func @_conv_stats_kernel(%arg0: i32, %arg1: i32, %arg2: memref<128x128xbf16, #tpu.memory_space<vmem>>, %arg3: memref<128x128xbf16, #tpu.memory_space<vmem>>, %arg4: memref<128x128xbf16, #tpu.memory_space<vmem>>, %arg5: memref<1x1x128xf32, #tpu.memory_space<vmem>>, %arg6: memref<1x1x128xf32, #tpu.memory_space<vmem>>) attributes {dimension_semantics = [#tpu.dimension_semantics<parallel>, #tpu.dimension_semantics<arbitrary>], iteration_bounds = array<i64: 1, 1>, scalar_prefetch = 0 : i64, scratch_operands = 0 : i64, tpu.core_type = #tpu.core_type<tc>, window_params = [{transform_indices = @transform_0, window_bounds = array<i64: 128, 128>}, {pipeline_mode = #tpu.pipeline_mode<synchronous>, transform_indices = @transform_1, window_bounds = array<i64: 128, 128>}, {transform_indices = @transform_2, window_bounds = array<i64: 128, 128>}, {transform_indices = @transform_3, window_bounds = array<i64: 1, 1, 128>}, {transform_indices = @transform_4, window_bounds = array<i64: 1, 1, 128>}]} {
    %c0_i32 = arith.constant 0 : i32
    %0 = arith.cmpi eq, %arg1, %c0_i32 : i32
    %1 = arith.extui %0 : i1 to i32
    %c0_i32_0 = arith.constant 0 : i32
    %2 = arith.cmpi ne, %1, %c0_i32_0 : i32
    scf.if %2 {
      %cst_20 = arith.constant 0.000000e+00 : f32
      %21 = vector.broadcast %cst_20 : f32 to vector<1x1x128xf32>
      %c0_21 = arith.constant 0 : index
      %c0_22 = arith.constant 0 : index
      %c0_23 = arith.constant 0 : index
      %22 = vector.load %arg5[%c0_21, %c0_22, %c0_23] : memref<1x1x128xf32, #tpu.memory_space<vmem>>, vector<1x1x128xf32>
      tpu.vector_store %arg5[%c0_21, %c0_22, %c0_23], %21 {strides = array<i32>} : memref<1x1x128xf32, #tpu.memory_space<vmem>>, vector<1x1x128xf32>,
      %cst_24 = arith.constant 0.000000e+00 : f32
      %23 = vector.broadcast %cst_24 : f32 to vector<1x1x128xf32>
      %c0_25 = arith.constant 0 : index
      %c0_26 = arith.constant 0 : index
      %c0_27 = arith.constant 0 : index
      %24 = vector.load %arg6[%c0_25, %c0_26, %c0_27] : memref<1x1x128xf32, #tpu.memory_space<vmem>>, vector<1x1x128xf32>
      tpu.vector_store %arg6[%c0_25, %c0_26, %c0_27], %23 {strides = array<i32>} : memref<1x1x128xf32, #tpu.memory_space<vmem>>, vector<1x1x128xf32>,
    } else {
    }
    %c0 = arith.constant 0 : index
    %c0_1 = arith.constant 0 : index
    %3 = vector.load %arg2[%c0, %c0_1] : memref<128x128xbf16, #tpu.memory_space<vmem>>, vector<128x128xbf16>
    %c0_2 = arith.constant 0 : index
    %c0_3 = arith.constant 0 : index
    %4 = vector.load %arg3[%c0_2, %c0_3] : memref<128x128xbf16, #tpu.memory_space<vmem>>, vector<128x128xbf16>
    %cst = arith.constant dense<0.000000e+00> : vector<128x128xf32>
    %5 = tpu.matmul %3, %4, %cst {dimension_numbers = #tpu.dot_dimension_numbers<[1], [0], [0], [1], [0, 0, 1, 1], [], []>} : vector<128x128xbf16>, vector<128x128xbf16>, vector<128x128xf32> -> vector<128x128xf32>
    %6 = arith.truncf %5 : vector<128x128xf32> to vector<128x128xbf16>
    %c0_4 = arith.constant 0 : index
    %c0_5 = arith.constant 0 : index
    %7 = vector.load %arg4[%c0_4, %c0_5] : memref<128x128xbf16, #tpu.memory_space<vmem>>, vector<128x128xbf16>
    tpu.vector_store %arg4[%c0_4, %c0_5], %6 {strides = array<i32>} : memref<128x128xbf16, #tpu.memory_space<vmem>>, vector<128x128xbf16>,
    %c0_6 = arith.constant 0 : index
    %c0_7 = arith.constant 0 : index
    %c0_8 = arith.constant 0 : index
    %8 = vector.load %arg5[%c0_6, %c0_7, %c0_8] : memref<1x1x128xf32, #tpu.memory_space<vmem>>, vector<1x1x128xf32>
    %cst_9 = arith.constant dense<0.000000e+00> : vector<128xf32>
    %9 = vector.multi_reduction <add>, %5, %cst_9 [0] : vector<128x128xf32> to vector<128xf32>
    %10 = vector.shape_cast %9 : vector<128xf32> to vector<1x128xf32>
    %11 = vector.shape_cast %10 : vector<1x128xf32> to vector<1x1x128xf32>
    %12 = arith.addf %8, %11 : vector<1x1x128xf32>
    %c0_10 = arith.constant 0 : index
    %c0_11 = arith.constant 0 : index
    %c0_12 = arith.constant 0 : index
    %13 = vector.load %arg5[%c0_10, %c0_11, %c0_12] : memref<1x1x128xf32, #tpu.memory_space<vmem>>, vector<1x1x128xf32>
    tpu.vector_store %arg5[%c0_10, %c0_11, %c0_12], %12 {strides = array<i32>} : memref<1x1x128xf32, #tpu.memory_space<vmem>>, vector<1x1x128xf32>,
    %c0_13 = arith.constant 0 : index
    %c0_14 = arith.constant 0 : index
    %c0_15 = arith.constant 0 : index
    %14 = vector.load %arg6[%c0_13, %c0_14, %c0_15] : memref<1x1x128xf32, #tpu.memory_space<vmem>>, vector<1x1x128xf32>
    %15 = arith.mulf %5, %5 : vector<128x128xf32>
    %cst_16 = arith.constant dense<0.000000e+00> : vector<128xf32>
    %16 = vector.multi_reduction <add>, %15, %cst_16 [0] : vector<128x128xf32> to vector<128xf32>
    %17 = vector.shape_cast %16 : vector<128xf32> to vector<1x128xf32>
    %18 = vector.shape_cast %17 : vector<1x128xf32> to vector<1x1x128xf32>
    %19 = arith.addf %14, %18 : vector<1x1x128xf32>
    %c0_17 = arith.constant 0 : index
    %c0_18 = arith.constant 0 : index
    %c0_19 = arith.constant 0 : index
    %20 = vector.load %arg6[%c0_17, %c0_18, %c0_19] : memref<1x1x128xf32, #tpu.memory_space<vmem>>, vector<1x1x128xf32>
    tpu.vector_store %arg6[%c0_17, %c0_18, %c0_19], %19 {strides = array<i32>} : memref<1x1x128xf32, #tpu.memory_space<vmem>>, vector<1x1x128xf32>,
    return
  }
  func.func @transform_0(%arg0: i32, %arg1: i32) -> (i32, i32) {
    %c1_i32 = arith.constant 1 : i32
    %0 = arith.muli %arg0, %c1_i32 : i32
    %1 = arith.addi %0, %arg1 : i32
    %c0_i32 = arith.constant 0 : i32
    %c0_i32_0 = arith.constant 0 : i32
    return %1, %c0_i32 : i32, i32
  }
  func.func @transform_1(%arg0: i32, %arg1: i32) -> (i32, i32) {
    %c0_i32 = arith.constant 0 : i32
    %c0_i32_0 = arith.constant 0 : i32
    %c0_i32_1 = arith.constant 0 : i32
    return %c0_i32, %c0_i32_0 : i32, i32
  }
  func.func @transform_2(%arg0: i32, %arg1: i32) -> (i32, i32) {
    %c1_i32 = arith.constant 1 : i32
    %0 = arith.muli %arg0, %c1_i32 : i32
    %1 = arith.addi %0, %arg1 : i32
    %c0_i32 = arith.constant 0 : i32
    %c0_i32_0 = arith.constant 0 : i32
    return %1, %c0_i32 : i32, i32
  }
  func.func @transform_3(%arg0: i32, %arg1: i32) -> (i32, i32, i32) {
    %c0_i32 = arith.constant 0 : i32
    %c0_i32_0 = arith.constant 0 : i32
    %c0_i32_1 = arith.constant 0 : i32
    return %arg0, %c0_i32, %c0_i32_0 : i32, i32, i32
  }
  func.func @transform_4(%arg0: i32, %arg1: i32) -> (i32, i32, i32) {
    %c0_i32 = arith.constant 0 : i32
    %c0_i32_0 = arith.constant 0 : i32
    %c0_i32_1 = arith.constant 0 : i32
    return %arg0, %c0_i32, %c0_i32_0 : i32, i32, i32
  }
}

</mosaic_0001>

<bundles_post_ra>
// kernel: tpu_custom_call.1
= control target key start
LH: loop header
LB: loop body
LE: loop exit
PB: predicated region body
PF: predicated region fallthrough
CT: control target
= control target key end

     0   :  { %10 = vsyncpa [#allocation3], 0  ;;  %s746_s0 = inlined_call_operand.hbm [shape: bf16[128,128], index: 0, kind: input, shape index: {}]   ;;  %s747_s1 = inlined_call_operand.hbm [shape: bf16[128,128], index: 1, kind: input, shape index: {}]   ;;  %s748_s2 = inlined_call_operand.hbm [shape: bf16[128,128], index: 2, kind: output, shape index: {0}]   ;;  %s749_s3 = inlined_call_operand.hbm [shape: f32[1,1,128], index: 3, kind: output, shape index: {1}]   ;;  %s750_s4 = inlined_call_operand.hbm [shape: f32[1,1,128], index: 4, kind: output, shape index: {2}]  }
   0x1   :  { %11 = vsyncpa [#allocation6], 0 }
   0x2   :  { %12 = vsyncpa [#allocation4], 0 }
   0x3   :  { %13 = vsyncpa [#allocation9], 0  ;;  %s22_s17 = sshll.u32 %s746_s0, 4  ;;  %s677_s18 = smov [#allocation2]   ;;  %s23_s17 = int_to_ptr.hbm [resolvable:$true] %s22_s17 }
   0x4   :  { %s24_s19 = sshll.u32 %s677_s18, 4  ;;  %s35_s22 = sshll.u32 %s747_s1, 4  ;;  %s25_s19 = int_to_ptr.vmem [resolvable:$true] %s24_s19  ;;  %s36_s22 = int_to_ptr.hbm [resolvable:$true] %s35_s22 }
   0x5   :  { %s678_s23 = smov 64   ;;  %s679_s24 = smov 4  }
   0x6   :  { %30 = dma.hbm_to_vmem [thread:$0]  %s23_s17, 1024, %s25_s19, [#allocation3], %s678_s23, %s678_s23, %s679_s24  }
   0x7   :  { %s680_s25 = smov [#allocation5]  }
   0x8   :  { %s37_s26 = sshll.u32 %s680_s25, 4  ;;  %s38_s26 = int_to_ptr.vmem [resolvable:$true] %s37_s26 }
   0x9   :  { %43 = dma.hbm_to_vmem [thread:$0]  %s36_s22, 1024, %s38_s26, [#allocation6], %s678_s23, %s678_s23, %s679_s24  }
   0xa   :  { %669 = dma.done.wait [#allocation3], 1024  }
   0xb   :  { %670 = vsyncadd [#allocation3], 4294966272 }
   0xc   :  { %671 = dma.done.wait [#allocation6], 1024  }
   0xd   :  { %672 = vsyncadd [#allocation6], 4294966272  ;;  %v469_v0 = vld [vmem:[#allocation5 + $0x38] sm:$0xff]  ;;  %v468_v1 = vld [vmem:[#allocation5 + $0x30] sm:$0xff]  ;;  %v681_v41 = vmov 0.0   ;;  %s682_s0 = smov [#allocation7]  }
   0xe   :  { %190 = vmatpush.bf16.msra.mxu0 %v469_v0  ;;  %517 = vmatpush.bf16.msra.mxu1 %v469_v0  ;;  %v467_v2 = vld [vmem:[#allocation5 + $0x28] sm:$0xff]  ;;  %v466_v3 = vld [vmem:[#allocation5 + $0x20] sm:$0xff]  ;;  %v465_v4 = vld [vmem:[#allocation5 + $0x18] sm:$0xff]  ;;  %60 = vst [vmem:[#allocation8] sm:$0x1] %v681_v41  ;;  %s343_s1 = sshll.u32 %s682_s0, 4  ;;  %s344_s1 = int_to_ptr.vmem [resolvable:$true] %s343_s1 }
   0xf   :  { %518 = vmatpush.bf16.msra.mxu2 %v469_v0  ;;  %519 = vmatpush.bf16.msra.mxu3 %v469_v0  ;;  %v464_v5 = vld [vmem:[#allocation5 + $0x10] sm:$0xff]  ;;  %v463_v6 = vld [vmem:[#allocation5 + $0x8] sm:$0xff]  ;;  %v462_v7 = vld [vmem:[#allocation5] sm:$0xff]  ;;  %61 = vst [vmem:[#allocation10] sm:$0x1] %v681_v41  ;;  %s345_s29 = sshll.u32 %s748_s2, 4  ;;  %s346_s29 = int_to_ptr.hbm [resolvable:$true] %s345_s29 }
  0x10   :  { %v454_v8 = vld [vmem:[#allocation2] sm:$0xff]  ;;  %v456_v9 = vld [vmem:[#allocation2 + $0x10] sm:$0xff]  ;;  %v455_v12 = vld [vmem:[#allocation2 + $0x8] sm:$0xff]  ;;  %s683_s2 = smov [#allocation8]   ;;  %s359_s7 = sshll.u32 %s749_s3, 4  ;;  %s360_s7 = int_to_ptr.hbm [resolvable:$true] %s359_s7 }
  0x11   :  { %v458_v10 = vld [vmem:[#allocation2 + $0x20] sm:$0xff]  ;;  %v460_v11 = vld [vmem:[#allocation2 + $0x30] sm:$0xff]  ;;  %v457_v13 = vld [vmem:[#allocation2 + $0x18] sm:$0xff]  ;;  %s357_s30 = sshll.u32 %s683_s2, 4  ;;  %s684_s8 = smov [#allocation10]   ;;  %s358_s30 = int_to_ptr.vmem [resolvable:$true] %s357_s30 }
  0x12   :  { %191 = vmatpush.bf16.msra.mxu0 %v468_v1  ;;  %520 = vmatpush.bf16.msra.mxu1 %v468_v1  ;;  %v459_v14 = vld [vmem:[#allocation2 + $0x28] sm:$0xff]  ;;  %v461_v15 = vld [vmem:[#allocation2 + $0x38] sm:$0xff]  ;;  %s368_s9 = sshll.u32 %s684_s8, 4  ;;  %s370_s12 = sshll.u32 %s750_s4, 4  ;;  %s369_s9 = int_to_ptr.vmem [resolvable:$true] %s368_s9  ;;  %s371_s12 = int_to_ptr.hbm [resolvable:$true] %s370_s12 }
  0x13   :  { %521 = vmatpush.bf16.msra.mxu2 %v468_v1  ;;  %522 = vmatpush.bf16.msra.mxu3 %v468_v1 }
  0x16   :  { %192 = vmatpush.bf16.msra.mxu0 %v467_v2  ;;  %523 = vmatpush.bf16.msra.mxu1 %v467_v2 }
  0x17   :  { %524 = vmatpush.bf16.msra.mxu2 %v467_v2  ;;  %525 = vmatpush.bf16.msra.mxu3 %v467_v2 }
  0x1a   :  { %193 = vmatpush.bf16.msra.mxu0 %v466_v3  ;;  %526 = vmatpush.bf16.msra.mxu1 %v466_v3 }
  0x1b   :  { %527 = vmatpush.bf16.msra.mxu2 %v466_v3  ;;  %528 = vmatpush.bf16.msra.mxu3 %v466_v3 }
  0x1e   :  { %194 = vmatpush.bf16.msra.mxu0 %v465_v4  ;;  %529 = vmatpush.bf16.msra.mxu1 %v465_v4 }
  0x1f   :  { %530 = vmatpush.bf16.msra.mxu2 %v465_v4  ;;  %531 = vmatpush.bf16.msra.mxu3 %v465_v4 }
  0x22   :  { %195 = vmatpush.bf16.msra.mxu0 %v464_v5  ;;  %532 = vmatpush.bf16.msra.mxu1 %v464_v5 }
  0x23   :  { %533 = vmatpush.bf16.msra.mxu2 %v464_v5  ;;  %534 = vmatpush.bf16.msra.mxu3 %v464_v5 }
  0x26   :  { %196 = vmatpush.bf16.msra.mxu0 %v463_v6  ;;  %535 = vmatpush.bf16.msra.mxu1 %v463_v6 }
  0x27   :  { %536 = vmatpush.bf16.msra.mxu2 %v463_v6  ;;  %537 = vmatpush.bf16.msra.mxu3 %v463_v6 }
  0x2a   :  { %197 = vmatpush.bf16.msra.mxu0 %v462_v7  ;;  %538 = vmatpush.bf16.msra.mxu1 %v462_v7 }
  0x2b   :  { %539 = vmatpush.bf16.msra.mxu2 %v462_v7  ;;  %540 = vmatpush.bf16.msra.mxu3 %v462_v7 }
  0x2d   :  { %198 = vmatmul.bf16.vlgmr.msra.gmra.mxu0 %v454_v8  ;;  %208 = vmatmul.bf16.vlgmr.msra.gmra.mxu1 %v456_v9 }
  0x2e   :  { %218 = vmatmul.bf16.vlgmr.msra.gmra.mxu2 %v458_v10  ;;  %228 = vmatmul.bf16.vlgmr.msra.gmra.mxu3 %v460_v11 }
  0x3d   :  { %203 = vmatmul.bf16.gmra.mxu0 %v455_v12  ;;  %213 = vmatmul.bf16.gmra.mxu1 %v457_v13 }
  0x3e   :  { %223 = vmatmul.bf16.gmra.mxu2 %v459_v14  ;;  %233 = vmatmul.bf16.gmra.mxu3 %v461_v15 }
  0xaa   :  { %v199_v16 = vpop.f32.mrf.mxu0  ;;  %v209_v17 = vpop.f32.mrf.mxu1 }
  0xab   :  { %v296_v31 = vmul.f32 %v199_v16, %v199_v16  ;;  %v300_v46 = vmul.f32 %v209_v17, %v209_v17 }
  0xb1   :  { %v219_v18 = vpop.f32.mrf.mxu2  ;;  %v722_v19 = vpop.f32.mrf.mxu3 }
  0xb2   :  { %v201_v20 = vpop.f32.mrf.mxu0  ;;  %v211_v21 = vpop.f32.mrf.mxu1  ;;  %v304_v62 = vmul.f32 %v219_v18, %v219_v18  ;;  %v308_v10 = vmul.f32 %v722_v19, %v722_v19 }
  0xb3   :  { %v473_v22 = vpack.c.bf16 %v201_v20, %v199_v16  ;;  %v483_v23 = vpack.c.bf16 %v211_v21, %v209_v17  ;;  %v297_v30 = vmul.f32 %v201_v20, %v201_v20  ;;  %v272_v33 = vadd.f32 %v201_v20, %v199_v16 }
  0xb4   :  { %v301_v49 = vmul.f32 %v211_v21, %v211_v21 }
  0xb5   :  { %474 = vst [vmem:[#allocation7] sm:$0xff] %v473_v22   ;;  %v312_v34 = vadd.f32 %v297_v30, %v296_v31 }
  0xb6   :  { %511 = vst [vmem:[#allocation7 + $0x10] sm:$0xff] %v483_v23  }
  0xb9   :  { %v221_v24 = vpop.f32.mrf.mxu2  ;;  %v724_v25 = vpop.f32.mrf.mxu3 }
  0xba   :  { %v204_v26 = vpop.f32.mrf.mxu0  ;;  %v214_v27 = vpop.f32.mrf.mxu1  ;;  %v493_v28 = vpack.c.bf16 %v221_v24, %v219_v18  ;;  %v503_v29 = vpack.c.bf16 %v724_v25, %v722_v19  ;;  %v305_v1 = vmul.f32 %v221_v24, %v221_v24  ;;  %v309_v13 = vmul.f32 %v724_v25, %v724_v25 }
  0xbb   :  { %v298_v32 = vmul.f32 %v204_v26, %v204_v26  ;;  %v273_v35 = vadd.f32 %v272_v33, %v204_v26  ;;  %v302_v52 = vmul.f32 %v214_v27, %v214_v27  ;;  %v271_v33 = vld [vmem:[#allocation8] sm:$0x1] }
  0xbc   :  { %513 = vst [vmem:[#allocation7 + $0x20] sm:$0xff] %v493_v28  }
  0xbd   :  { %515 = vst [vmem:[#allocation7 + $0x30] sm:$0xff] %v503_v29   ;;  %v313_v38 = vadd.f32 %v312_v34, %v298_v32 }
  0xc1   :  { %v224_v36 = vpop.f32.mrf.mxu2  ;;  %v234_v37 = vpop.f32.mrf.mxu3 }
  0xc2   :  { %v206_v39 = vpop.f32.mrf.mxu0  ;;  %v216_v40 = vpop.f32.mrf.mxu1  ;;  %v306_v5 = vmul.f32 %v224_v36, %v224_v36 }
  0xc3   :  { %v478_v42 = vpack.c.bf16 %v206_v39, %v204_v26  ;;  %v274_v43 = vadd.f32 %v273_v35, %v206_v39  ;;  %v299_v44 = vmul.f32 %v206_v39, %v206_v39  ;;  %v488_v45 = vpack.c.bf16 %v216_v40, %v214_v27  ;;  %v295_v35 = vld [vmem:[#allocation10] sm:$0x1] }
  0xc4   :  { %v303_v60 = vmul.f32 %v216_v40, %v216_v40 }
  0xc5   :  { %510 = vst [vmem:[#allocation7 + $0x8] sm:$0xff] %v478_v42   ;;  %v275_v47 = vadd.f32 %v274_v43, %v209_v17  ;;  %v314_v48 = vadd.f32 %v313_v38, %v299_v44  ;;  %v310_v17 = vmul.f32 %v234_v37, %v234_v37 }
  0xc6   :  { %512 = vst [vmem:[#allocation7 + $0x18] sm:$0xff] %v488_v45  }
  0xc7   :  { %v315_v50 = vadd.f32 %v314_v48, %v300_v46  ;;  %v276_v51 = vadd.f32 %v275_v47, %v211_v21 }
  0xc9   :  { %v277_v53 = vadd.f32 %v276_v51, %v214_v27  ;;  %v316_v54 = vadd.f32 %v315_v50, %v301_v49  ;;  %v226_v55 = vpop.f32.mrf.mxu2  ;;  %v236_v56 = vpop.f32.mrf.mxu3 }
  0xca   :  { %v498_v57 = vpack.c.bf16 %v226_v55, %v224_v36  ;;  %v508_v58 = vpack.c.bf16 %v236_v56, %v234_v37  ;;  %v307_v9 = vmul.f32 %v226_v55, %v226_v55  ;;  %v311_v22 = vmul.f32 %v236_v56, %v236_v56 }
  0xcb   :  { %v278_v59 = vadd.f32 %v277_v53, %v216_v40  ;;  %v317_v61 = vadd.f32 %v316_v54, %v302_v52 }
  0xcc   :  { %514 = vst [vmem:[#allocation7 + $0x28] sm:$0xff] %v498_v57  }
  0xcd   :  { %v279_v63 = vadd.f32 %v278_v59, %v219_v18  ;;  %v318_v0 = vadd.f32 %v317_v61, %v303_v60  ;;  %516 = vst [vmem:[#allocation7 + $0x38] sm:$0xff] %v508_v58  }
  0xce   :  { %351 = dma.vmem_to_hbm [thread:$0]  %s344_s1, 1024, %s346_s29, [#allocation4], %s678_s23, %s678_s23, %s679_s24  }
  0xcf   :  { %v319_v2 = vadd.f32 %v318_v0, %v304_v62  ;;  %v280_v3 = vadd.f32 %v279_v63, %v221_v24 }
  0xd1   :  { %v281_v4 = vadd.f32 %v280_v3, %v224_v36  ;;  %v320_v6 = vadd.f32 %v319_v2, %v305_v1 }
  0xd3   :  { %v321_v7 = vadd.f32 %v320_v6, %v306_v5  ;;  %v282_v8 = vadd.f32 %v281_v4, %v226_v55 }
  0xd5   :  { %v283_v11 = vadd.f32 %v282_v8, %v722_v19  ;;  %v322_v12 = vadd.f32 %v321_v7, %v307_v9 }
  0xd7   :  { %v323_v14 = vadd.f32 %v322_v12, %v308_v10  ;;  %v284_v15 = vadd.f32 %v283_v11, %v724_v25 }
  0xd9   :  { %v285_v16 = vadd.f32 %v284_v15, %v234_v37  ;;  %v324_v18 = vadd.f32 %v323_v14, %v309_v13 }
  0xdb   :  { %v325_v20 = vadd.f32 %v324_v18, %v310_v17  ;;  %v286_v21 = vadd.f32 %v285_v16, %v236_v56 }
  0xdd   :  { %v287_v23 = vrot.slane %v286_v21, 4  ;;  %v326_v24 = vadd.f32 %v325_v20, %v311_v22 }
  0xdf   :  { %v288_v26 = vadd.f32 %v287_v23, %v286_v21  ;;  %v327_v27 = vrot.slane %v326_v24, 4 }
  0xe1   :  { %v289_v28 = vrot.slane %v288_v26, 2  ;;  %v328_v29 = vadd.f32 %v327_v27, %v326_v24 }
  0xe3   :  { %v290_v19 = vadd.f32 %v289_v28, %v288_v26  ;;  %v329_v30 = vrot.slane %v328_v29, 2 }
  0xe5   :  { %v291_v31 = vrot.slane %v290_v19, 1  ;;  %v330_v32 = vadd.f32 %v329_v30, %v328_v29 }
  0xe7   :  { %v292_v25 = vadd.f32 %v291_v31, %v290_v19  ;;  %v331_v34 = vrot.slane %v330_v32, 1 }
  0xe9   :  { %v332_v36 = vadd.f32 %v331_v34, %v330_v32  ;;  %v293_v37 = vadd.f32 %v292_v25, %v271_v33 }
  0xeb   :  { %294 = vst [vmem:[#allocation8] sm:$0x1] %v293_v37  ;;  %v333_v38 = vadd.f32 %v332_v36, %v295_v35 }
  0xec   :  { %362 = dma.vmem_to_hbm [thread:$0]  %s358_s30, 16, %s360_s7, [#allocation9]  }
  0xed   :  { %334 = vst [vmem:[#allocation10] sm:$0x1] %v333_v38 }
  0xee   :  { %373 = dma.vmem_to_hbm [thread:$0]  %s369_s9, 16, %s371_s12, [#allocation9]  }
  0xef   :  { %673 = dma.done.wait [#allocation4], 1024  }
  0xf0   :  { %674 = vsyncadd [#allocation4], 4294966272 }
  0xf1   :  { %675 = dma.done.wait [#allocation9], 32  }
  0xf2   :  { %676 = vsyncadd [#allocation9], 4294967264 }
  0xf3   :  { %386 = vsyncpa [#allocation3], 1 }
  0xf4   :  { %387 = vsyncpa [#allocation6], 1 }
  0xf5   :  { %388 = vsyncpa [#allocation4], 1 }
  0xf6   :  { %389 = vsyncpa [#allocation9], 1 }

</bundles_post_ra>
